<compile_context>
chip_gen: v7x
topology: tpu7x:2x2x1
jax: 0.10.0
libtpu: 0.0.40
codegen_flags: <defaults>
</compile_context>

<pallas_src>
import functools

import jax
import jax.numpy as jnp
from jax import lax
from jax.experimental import pallas as pl
from jax.experimental.pallas import tpu as pltpu


# Safe scoped-VMEM setting on all of v5e / v6e / v7x (v7x physical = 64 MiB).
_VMEM_LIMIT = 32 * 1024 * 1024


def _round_up(x, m):
    return ((x + m - 1) // m) * m


def _largest_divisor_leq(n, target):
    t = max(1, min(target, n))
    while n % t:
        t -= 1
    return t


def _pick_batch_tile(batch, target=256):
    """Batch tile for the recurrence: multiple of 8 (f32 sublane) or full batch."""
    if batch <= target:
        return batch
    for tb in range(min(target, batch), 7, -1):
        if batch % tb == 0 and tb % 8 == 0:
            return tb
    return batch


def _pad_rows(x2d, m_pad):
    m = x2d.shape[0]
    if m_pad == m:
        return x2d
    return jnp.pad(x2d, ((0, m_pad - m), (0, 0)))


# ---------------------------------------------------------------------------
# GEMM kernels: time-parallel work hoisted out of the recurrence
# (M = seq*batch axis tiled; weights/biases resident via constant index_map)
# ---------------------------------------------------------------------------
def _linear_kernel(x_ref, wt_ref, b_ref, o_ref):
    """o = x @ wt + b   (wt pre-transposed bf16, b shaped (1, N) f32)."""
    o_ref[...] = (jnp.dot(x_ref[...], wt_ref[...],
                          preferred_element_type=jnp.float32)
                  + b_ref[...]).astype(o_ref.dtype)


def _embed_project_kernel(x_ref, wembt_ref, bemb_ref, wiht_ref, b_ref, o_ref):
    """o = (x @ wemb_t + bemb) @ wih_t + b  (embedding fused w/ layer-0 proj)."""
    emb = (jnp.dot(x_ref[...], wembt_ref[...],
                   preferred_element_type=jnp.float32) + bemb_ref[...])
    # TODO(synk): training-mode dropout on `emb` omitted (inference path);
    # would need pltpu.prng_seed / pltpu.prng_random_bits here.
    o_ref[...] = (jnp.dot(emb.astype(wiht_ref.dtype), wiht_ref[...],
                          preferred_element_type=jnp.float32)
                  + b_ref[...]).astype(o_ref.dtype)


def _pallas_linear(x2d, wt, b, *, out_dtype, tm_target=512):
    m, k = x2d.shape
    n = wt.shape[1]
    tm = min(tm_target, _round_up(m, 8))          # <=512 keeps v7x VMEM happy
    m_pad = _round_up(m, tm)
    xp = _pad_rows(x2d, m_pad)
    out = pl.pallas_call(
        _linear_kernel,
        grid=(m_pad // tm,),
        in_specs=[pl.BlockSpec((tm, k), lambda i: (i, 0)),
                  pl.BlockSpec((k, n), lambda i: (0, 0)),     # resident W^T
                  pl.BlockSpec((1, n), lambda i: (0, 0))],    # resident bias
        out_specs=pl.BlockSpec((tm, n), lambda i: (i, 0)),
        out_shape=jax.ShapeDtypeStruct((m_pad, n), out_dtype),
        compiler_params=pltpu.CompilerParams(
            dimension_semantics=("parallel",),
            vmem_limit_bytes=_VMEM_LIMIT),
    )(xp, wt, b)
    return out[:m]


def _pallas_embed_project(x2d, wemb_t, b_emb, wih_t, bias, *, out_dtype,
                          tm_target=512):
    m, k = x2d.shape
    n = wih_t.shape[1]                            # 4 * hid_dim
    tm = min(tm_target, _round_up(m, 8))
    m_pad = _round_up(m, tm)
    xp = _pad_rows(x2d, m_pad)
    out = pl.pallas_call(
        _embed_project_kernel,
        grid=(m_pad // tm,),
        in_specs=[pl.BlockSpec((tm, k), lambda i: (i, 0)),
                  pl.BlockSpec((k, k), lambda i: (0, 0)),     # resident W_emb^T
                  pl.BlockSpec((1, k), lambda i: (0, 0)),     # resident b_emb
                  pl.BlockSpec((k, n), lambda i: (0, 0)),     # resident W_ih^T
                  pl.BlockSpec((1, n), lambda i: (0, 0))],    # resident bias
        out_specs=pl.BlockSpec((tm, n), lambda i: (i, 0)),
        out_shape=jax.ShapeDtypeStruct((m_pad, n), out_dtype),
        compiler_params=pltpu.CompilerParams(
            dimension_semantics=("parallel",),
            vmem_limit_bytes=_VMEM_LIMIT),
    )(xp, wemb_t, b_emb, wih_t, bias)
    return out[:m]


# ---------------------------------------------------------------------------
# Recurrent kernel: (batch-parallel, time-sequential) grid, T_CHUNK steps per
# grid iteration, h/c persist in f32 VMEM scratch, W_hh^T resident (bf16).
# ---------------------------------------------------------------------------
def _lstm_scan_kernel(gx_ref, whh_t_ref, out_ref, hfin_ref, cfin_ref,
                      h_scr, c_scr, *, hid_dim, t_chunk):
    tc = pl.program_id(1)

    @pl.when(tc == 0)
    def _():
        h_scr[...] = jnp.zeros_like(h_scr)
        c_scr[...] = jnp.zeros_like(c_scr)

    def step(t, carry):
        h = h_scr[...]
        # gx_ref[t]: (tb, 4*hid) = x_t @ W_ih^T + b_ih + b_hh (precomputed, bf16)
        gates = (gx_ref[t].astype(jnp.float32)
                 + jnp.dot(h.astype(whh_t_ref.dtype), whh_t_ref[...],
                           preferred_element_type=jnp.float32))
        i = jax.nn.sigmoid(gates[:, 0 * hid_dim:1 * hid_dim])
        f = jax.nn.sigmoid(gates[:, 1 * hid_dim:2 * hid_dim])
        g = jnp.tanh(gates[:, 2 * hid_dim:3 * hid_dim])
        o = jax.nn.sigmoid(gates[:, 3 * hid_dim:4 * hid_dim])
        c = f * c_scr[...] + i * g
        h_new = o * jnp.tanh(c)
        h_scr[...] = h_new
        c_scr[...] = c
        out_ref[t] = h_new.astype(out_ref.dtype)   # next layer's input (bf16)
        return carry

    lax.fori_loop(0, t_chunk, step, 0, unroll=True)

    # Final states written only once, on the last time chunk.
    @pl.when(tc == pl.num_programs(1) - 1)
    def _():
        hfin_ref[...] = h_scr[...].astype(hfin_ref.dtype)
        cfin_ref[...] = c_scr[...].astype(cfin_ref.dtype)


def _pallas_lstm_layer(gates_x, w_hh_t, hid_dim, *, t_chunk_target=8,
                       batch_tile_target=256, state_dtype=jnp.float32):
    """gates_x: (seq, batch, 4*hid) precomputed input gates (bf16); returns
    (out_seq (seq,batch,hid) bf16, h_final (batch,hid) f32, c_final f32)."""
    seq, batch, four_h = gates_x.shape
    t_chunk = _largest_divisor_leq(seq, t_chunk_target)
    tb = _pick_batch_tile(batch, batch_tile_target)
    kernel = functools.partial(_lstm_scan_kernel, hid_dim=hid_dim,
                               t_chunk=t_chunk)
    return pl.pallas_call(
        kernel,
        grid=(batch // tb, seq // t_chunk),
        in_specs=[
            pl.BlockSpec((t_chunk, tb, four_h), lambda b, t: (t, b, 0)),
            pl.BlockSpec((hid_dim, four_h), lambda b, t: (0, 0)),  # resident W_hh^T
        ],
        out_specs=(
            pl.BlockSpec((t_chunk, tb, hid_dim), lambda b, t: (t, b, 0)),
            pl.BlockSpec((tb, hid_dim), lambda b, t: (b, 0)),
            pl.BlockSpec((tb, hid_dim), lambda b, t: (b, 0)),
        ),
        out_shape=(
            jax.ShapeDtypeStruct((seq, batch, hid_dim), gates_x.dtype),
            jax.ShapeDtypeStruct((batch, hid_dim), state_dtype),
            jax.ShapeDtypeStruct((batch, hid_dim), state_dtype),
        ),
        scratch_shapes=[pltpu.VMEM((tb, hid_dim), jnp.float32),
                        pltpu.VMEM((tb, hid_dim), jnp.float32)],
        compiler_params=pltpu.CompilerParams(
            dimension_semantics=("parallel", "arbitrary"),  # batch x time
            vmem_limit_bytes=_VMEM_LIMIT),
    )(gates_x, w_hh_t)


# ---------------------------------------------------------------------------
# Module forward
# ---------------------------------------------------------------------------
def encoder_lstm_forward(src, params, *, hid_dim, n_layers,
                         compute_dtype=jnp.bfloat16):
    """src: (seq, batch, input_dim).  Returns (hidden, cell), each
    (n_layers, batch, hid_dim) -- matches PyTorch Encoder_LSTM.forward."""
    seq, batch, input_dim = src.shape
    cd = compute_dtype
    x2d = src.reshape(seq * batch, input_dim).astype(cd)

    h_finals, c_finals = [], []
    for layer in range(n_layers):
        w_ih = params[f"w_ih_{layer}"]
        w_hh = params[f"w_hh_{layer}"]
        bias = (params[f"b_ih_{layer}"]
                + params[f"b_hh_{layer}"]).astype(jnp.float32)
        n = 4 * hid_dim
        if layer == 0:
            gates2d = _pallas_embed_project(
                x2d,
                params["w_emb"].T.astype(cd),
                params["b_emb"].reshape(1, -1).astype(jnp.float32),
                w_ih.T.astype(cd),
                bias.reshape(1, n),
                out_dtype=cd)
        else:
            gates2d = _pallas_linear(x2d, w_ih.T.astype(cd),
                                     bias.reshape(1, n), out_dtype=cd)
        gates = gates2d.reshape(seq, batch, n)

        out_seq, h_fin, c_fin = _pallas_lstm_layer(
            gates, w_hh.T.astype(cd), hid_dim)
        # TODO(synk): nn.LSTM inter-layer dropout (training mode) omitted.
        x2d = out_seq.reshape(seq * batch, hid_dim)
        h_finals.append(h_fin)
        c_finals.append(c_fin)

    return jnp.stack(h_finals, axis=0), jnp.stack(c_finals, axis=0)


# ---------------------------------------------------------------------------
# Pure-JAX reference (matches torch semantics, eval mode / dropout=0).
# compute_dtype lets us mirror the kernel's bf16 matmul casts exactly.
# ---------------------------------------------------------------------------
def _ref_encoder_lstm(src, params, *, hid_dim, n_layers,
                      compute_dtype=jnp.float32):
    cd = compute_dtype

    def mm(a, b):
        return jnp.dot(a.astype(cd), b.astype(cd),
                       preferred_element_type=jnp.float32)

    seq, batch, _ = src.shape
    x = mm(src, params["w_emb"].T) + params["b_emb"]
    hs, cs = [], []
    for layer in range(n_layers):
        w_ih = params[f"w_ih_{layer}"]
        w_hh = params[f"w_hh_{layer}"]
        b = params[f"b_ih_{layer}"] + params[f"b_hh_{layer}"]
        gx = (mm(x, w_ih.T) + b).astype(cd)        # gates_x stored at cd
        h = jnp.zeros((batch, hid_dim), jnp.float32)
        c = jnp.zeros((batch, hid_dim), jnp.float32)
        outs = []
        for t in range(seq):
            gates = gx[t].astype(jnp.float32) + mm(h, w_hh.T)
            i = jax.nn.sigmoid(gates[:, 0 * hid_dim:1 * hid_dim])
            f = jax.nn.sigmoid(gates[:, 1 * hid_dim:2 * hid_dim])
            g = jnp.tanh(gates[:, 2 * hid_dim:3 * hid_dim])
            o = jax.nn.sigmoid(gates[:, 3 * hid_dim:4 * hid_dim])
            c = f * c + i * g
            h = o * jnp.tanh(c)
            outs.append(h)
        x = jnp.stack(outs, axis=0).astype(cd)
        hs.append(h)
        cs.append(c)
    return jnp.stack(hs, axis=0), jnp.stack(cs, axis=0)


if __name__ == "__main__":
    # Module config (dropout=0.0 -> inference-equivalent forward).
    # hid_dim=128 (lane-dense), batch=8 (f32 sublane), per review.
    input_dim, hid_dim, n_layers = 128, 128, 2
    seq, batch = 16, 8

    key = jax.random.PRNGKey(0)
    keys = jax.random.split(key, 3 + 4 * n_layers)
    scale = 1.0 / jnp.sqrt(hid_dim)

    params = {
        "w_emb": scale * jax.random.normal(keys[0], (input_dim, input_dim), jnp.float32),
        "b_emb": scale * jax.random.normal(keys[1], (input_dim,), jnp.float32),
    }
    kidx = 2
    for layer in range(n_layers):
        in_l = input_dim if layer == 0 else hid_dim
        params[f"w_ih_{layer}"] = scale * jax.random.normal(
            keys[kidx + 0], (4 * hid_dim, in_l), jnp.float32)
        params[f"w_hh_{layer}"] = scale * jax.random.normal(
            keys[kidx + 1], (4 * hid_dim, hid_dim), jnp.float32)
        params[f"b_ih_{layer}"] = scale * jax.random.normal(
            keys[kidx + 2], (4 * hid_dim,), jnp.float32)
        params[f"b_hh_{layer}"] = scale * jax.random.normal(
            keys[kidx + 3], (4 * hid_dim,), jnp.float32)
        kidx += 4

    src = jax.random.normal(keys[kidx], (seq, batch, input_dim), jnp.float32)

    hidden, cell = encoder_lstm_forward(src, params,
                                        hid_dim=hid_dim, n_layers=n_layers)
    hidden, cell = jax.block_until_ready((hidden, cell))

    assert hidden.shape == (n_layers, batch, hid_dim)
    assert cell.shape == (n_layers, batch, hid_dim)

    # Strict check vs a reference performing the same bf16 matmul casts.
    ref_h_bf, ref_c_bf = _ref_encoder_lstm(src, params, hid_dim=hid_dim,
                                           n_layers=n_layers,
                                           compute_dtype=jnp.bfloat16)
    assert jnp.allclose(hidden, ref_h_bf, atol=5e-3, rtol=5e-3), "hidden mismatch (bf16 ref)"
    assert jnp.allclose(cell, ref_c_bf, atol=5e-3, rtol=5e-3), "cell mismatch (bf16 ref)"

    # Loose sanity check vs the pure-f32 semantic reference (bf16 MXU noise).
    ref_h, ref_c = _ref_encoder_lstm(src, params, hid_dim=hid_dim,
                                     n_layers=n_layers,
                                     compute_dtype=jnp.float32)
    assert jnp.allclose(hidden, ref_h, atol=5e-2, rtol=5e-2), "hidden mismatch (f32 ref)"
    assert jnp.allclose(cell, ref_c, atol=5e-2, rtol=5e-2), "cell mismatch (f32 ref)"

    print("KERNEL_OK")
</pallas_src>

<mosaic_0001>
module attributes {stable_mosaic.version = 11 : i64} {
  func.func @_embed_project_kernel(%arg0: i32, %arg1: memref<128x128xbf16, #tpu.memory_space<vmem>>, %arg2: memref<128x128xbf16, #tpu.memory_space<vmem>>, %arg3: memref<1x128xf32, #tpu.memory_space<vmem>>, %arg4: memref<128x512xbf16, #tpu.memory_space<vmem>>, %arg5: memref<1x512xf32, #tpu.memory_space<vmem>>, %arg6: memref<128x512xbf16, #tpu.memory_space<vmem>>) attributes {dimension_semantics = [#tpu.dimension_semantics<parallel>], iteration_bounds = array<i64: 1>, scalar_prefetch = 0 : i64, scratch_operands = 0 : i64, tpu.core_type = #tpu.core_type<tc>, window_params = [{transform_indices = @transform_0, window_bounds = array<i64: 128, 128>}, {pipeline_mode = #tpu.pipeline_mode<synchronous>, transform_indices = @transform_1, window_bounds = array<i64: 128, 128>}, {pipeline_mode = #tpu.pipeline_mode<synchronous>, transform_indices = @transform_2, window_bounds = array<i64: 1, 128>}, {pipeline_mode = #tpu.pipeline_mode<synchronous>, transform_indices = @transform_3, window_bounds = array<i64: 128, 512>}, {pipeline_mode = #tpu.pipeline_mode<synchronous>, transform_indices = @transform_4, window_bounds = array<i64: 1, 512>}, {transform_indices = @transform_5, window_bounds = array<i64: 128, 512>}]} {
    %c0 = arith.constant 0 : index
    %c0_0 = arith.constant 0 : index
    %0 = vector.load %arg1[%c0, %c0_0] : memref<128x128xbf16, #tpu.memory_space<vmem>>, vector<128x128xbf16>
    %c0_1 = arith.constant 0 : index
    %c0_2 = arith.constant 0 : index
    %1 = vector.load %arg2[%c0_1, %c0_2] : memref<128x128xbf16, #tpu.memory_space<vmem>>, vector<128x128xbf16>
    %cst = arith.constant dense<0.000000e+00> : vector<128x128xf32>
    %2 = tpu.matmul %0, %1, %cst {dimension_numbers = #tpu.dot_dimension_numbers<[1], [0], [0], [1], [0, 0, 1, 1], [], []>} : vector<128x128xbf16>, vector<128x128xbf16>, vector<128x128xf32> -> vector<128x128xf32>
    %c0_3 = arith.constant 0 : index
    %c0_4 = arith.constant 0 : index
    %3 = vector.load %arg3[%c0_3, %c0_4] : memref<1x128xf32, #tpu.memory_space<vmem>>, vector<1x128xf32>
    %4 = vector.broadcast %3 : vector<1x128xf32> to vector<128x128xf32>
    %5 = arith.addf %2, %4 : vector<128x128xf32>
    %6 = arith.truncf %5 : vector<128x128xf32> to vector<128x128xbf16>
    %c0_5 = arith.constant 0 : index
    %c0_6 = arith.constant 0 : index
    %7 = vector.load %arg4[%c0_5, %c0_6] : memref<128x512xbf16, #tpu.memory_space<vmem>>, vector<128x512xbf16>
    %cst_7 = arith.constant dense<0.000000e+00> : vector<128x512xf32>
    %8 = tpu.matmul %6, %7, %cst_7 {dimension_numbers = #tpu.dot_dimension_numbers<[1], [0], [0], [1], [0, 0, 1, 1], [], []>} : vector<128x128xbf16>, vector<128x512xbf16>, vector<128x512xf32> -> vector<128x512xf32>
    %c0_8 = arith.constant 0 : index
    %c0_9 = arith.constant 0 : index
    %9 = vector.load %arg5[%c0_8, %c0_9] : memref<1x512xf32, #tpu.memory_space<vmem>>, vector<1x512xf32>
    %10 = vector.broadcast %9 : vector<1x512xf32> to vector<128x512xf32>
    %11 = arith.addf %8, %10 : vector<128x512xf32>
    %12 = arith.truncf %11 : vector<128x512xf32> to vector<128x512xbf16>
    %c0_10 = arith.constant 0 : index
    %c0_11 = arith.constant 0 : index
    %13 = vector.load %arg6[%c0_10, %c0_11] : memref<128x512xbf16, #tpu.memory_space<vmem>>, vector<128x512xbf16>
    tpu.vector_store %arg6[%c0_10, %c0_11], %12 {strides = array<i32>} : memref<128x512xbf16, #tpu.memory_space<vmem>>, vector<128x512xbf16>,
    return
  }
  func.func @transform_0(%arg0: i32) -> (i32, i32) {
    %c0_i32 = arith.constant 0 : i32
    %c0_i32_0 = arith.constant 0 : i32
    return %arg0, %c0_i32 : i32, i32
  }
  func.func @transform_1(%arg0: i32) -> (i32, i32) {
    %c0_i32 = arith.constant 0 : i32
    %c0_i32_0 = arith.constant 0 : i32
    %c0_i32_1 = arith.constant 0 : i32
    return %c0_i32, %c0_i32_0 : i32, i32
  }
  func.func @transform_2(%arg0: i32) -> (i32, i32) {
    %c0_i32 = arith.constant 0 : i32
    %c0_i32_0 = arith.constant 0 : i32
    %c0_i32_1 = arith.constant 0 : i32
    return %c0_i32, %c0_i32_0 : i32, i32
  }
  func.func @transform_3(%arg0: i32) -> (i32, i32) {
    %c0_i32 = arith.constant 0 : i32
    %c0_i32_0 = arith.constant 0 : i32
    %c0_i32_1 = arith.constant 0 : i32
    return %c0_i32, %c0_i32_0 : i32, i32
  }
  func.func @transform_4(%arg0: i32) -> (i32, i32) {
    %c0_i32 = arith.constant 0 : i32
    %c0_i32_0 = arith.constant 0 : i32
    %c0_i32_1 = arith.constant 0 : i32
    return %c0_i32, %c0_i32_0 : i32, i32
  }
  func.func @transform_5(%arg0: i32) -> (i32, i32) {
    %c0_i32 = arith.constant 0 : i32
    %c0_i32_0 = arith.constant 0 : i32
    return %arg0, %c0_i32 : i32, i32
  }
}

</mosaic_0001>

<bundles_post_ra>
// kernel: tpu_custom_call.1
= control target key start
LH: loop header
LB: loop body
LE: loop exit
PB: predicated region body
PF: predicated region fallthrough
CT: control target
= control target key end

     0   :  { %10 = vsyncpa [#allocation3], 0  ;;  %s1587_s0 = inlined_call_operand.hbm [shape: bf16[128,128], index: 0, kind: input, shape index: {}]   ;;  %s1588_s1 = inlined_call_operand.hbm [shape: bf16[128,128], index: 1, kind: input, shape index: {}]   ;;  %s1589_s2 = inlined_call_operand.vmem [shape: f32[1,128], index: 2, kind: input, shape index: {}]   ;;  %s1590_s3 = inlined_call_operand.hbm [shape: bf16[128,512], index: 3, kind: input, shape index: {}]   ;;  %s1591_s4 = inlined_call_operand.vmem [shape: f32[1,512], index: 4, kind: input, shape index: {}]   ;;  %s1592_s5 = inlined_call_operand.hbm [shape: bf16[128,512], index: 5, kind: output, shape index: {}]  }
   0x1   :  { %11 = vsyncpa [#allocation6], 0 }
   0x2   :  { %12 = vsyncpa [#allocation4], 0  ;;  %s1329_s18 = smov [#allocation5]   ;;  %s1330_s20 = smov [#allocation2]  }
   0x3   :  { %s30_s19 = sshll.u32 %s1329_s18, 4  ;;  %s18_s21 = sshll.u32 %s1330_s20, 4  ;;  %s31_s19 = int_to_ptr.vmem [resolvable:$true] %s30_s19  ;;  %s1368_s21 = int_to_ptr.vmem [resolvable:$true] %s18_s21 }
   0x4   :  { %s1235_s24 = scalar_lea.hbm %s1588_s1, 1024 }
   0x5   :  { %p1236_p0 = scmp.ne.s32.totalorder %s1588_s1, %s1235_s24  ;;  %p1239_p1 = scmp.lt.u32.totalorder %s1235_s24, %s1588_s1 }
   0x7   :  { %p1241_p2 = pnand %p1239_p1, %p1236_p0 }
   0x9   :  { %1244 = shalt.err (!%p1241_p2)
}
   0xa   :  { %s1245_s29 = scalar_lea.vmem %s31_s19, 1024  ;;  %p1250_p4 = scmp.lt.s32.totalorder %s31_s19, %s31_s19 }
   0xb   :  { %p1246_p3 = scmp.ne.s32.totalorder %s31_s19, %s1245_s29  ;;  %p1251_p5 = scmp.lt.s32.totalorder %s1245_s29, %s1245_s29 }
   0xd   :  { %p1252_p6 = por %p1251_p5, %p1250_p4 }
   0xf   :  { %p1253_p7 = pnand %p1252_p6, %p1246_p3 }
  0x11   :  { %1256 = shalt.err (!%p1253_p7)
}
  0x12   :  { %s1331_s30 = smov 64   ;;  %s1332_s6 = smov 4  }
  0x13   :  { %36 = dma.hbm_to_vmem [thread:$0]  %s1588_s1, 1024, %s31_s19, [#allocation6], %s1331_s30, %s1331_s30, %s1332_s6  }
  0x14   :  { %s1257_s11 = scalar_lea.hbm %s1587_s0, 1024 }
  0x15   :  { %p1258_p8 = scmp.ne.s32.totalorder %s1587_s0, %s1257_s11  ;;  %p1261_p9 = scmp.lt.u32.totalorder %s1257_s11, %s1587_s0 }
  0x17   :  { %p1263_p10 = pnand %p1261_p9, %p1258_p8 }
  0x19   :  { %1266 = shalt.err (!%p1263_p10)
}
  0x1a   :  { %s1267_s16 = scalar_lea.vmem %s1368_s21, 1024  ;;  %p1272_p12 = scmp.lt.s32.totalorder %s1368_s21, %s1368_s21 }
  0x1b   :  { %p1268_p11 = scmp.ne.s32.totalorder %s1368_s21, %s1267_s16  ;;  %p1273_p13 = scmp.lt.s32.totalorder %s1267_s16, %s1267_s16 }
  0x1d   :  { %p1274_p0 = por %p1273_p13, %p1272_p12 }
  0x1f   :  { %p1275_p1 = pnand %p1274_p0, %p1268_p11 }
  0x21   :  { %1278 = shalt.err (!%p1275_p1)
}
  0x22   :  { %24 = dma.hbm_to_vmem [thread:$0]  %s1587_s0, 1024, %s1368_s21, [#allocation3], %s1331_s30, %s1331_s30, %s1332_s6  }
  0x23   :  { %s1333_s18 = smov [#allocation7]   ;;  %s1279_s23 = scalar_lea.hbm %s1590_s3, 4096 }
  0x24   :  { %s44_s19 = sshll.u32 %s1333_s18, 4  ;;  %p1280_p2 = scmp.ne.s32.totalorder %s1590_s3, %s1279_s23  ;;  %s45_s19 = int_to_ptr.vmem [resolvable:$true] %s44_s19 }
  0x25   :  { %p1283_p3 = scmp.lt.u32.totalorder %s1279_s23, %s1590_s3 }
  0x27   :  { %p1285_p4 = pnand %p1283_p3, %p1280_p2 }
  0x29   :  { %1288 = shalt.err (!%p1285_p4)
}
  0x2a   :  { %s1289_s28 = scalar_lea.vmem %s45_s19, 4096  ;;  %p1294_p6 = scmp.lt.s32.totalorder %s45_s19, %s45_s19 }
  0x2b   :  { %p1290_p5 = scmp.ne.s32.totalorder %s45_s19, %s1289_s28  ;;  %p1295_p7 = scmp.lt.s32.totalorder %s1289_s28, %s1289_s28 }
  0x2d   :  { %p1296_p8 = por %p1295_p7, %p1294_p6 }
  0x2f   :  { %p1297_p9 = pnand %p1296_p8, %p1290_p5 }
  0x31   :  { %1300 = shalt.err (!%p1297_p9)
}
  0x32   :  { %s1334_s0 = smov 256   ;;  %s1335_s21 = smov 16  }
  0x33   :  { %50 = dma.hbm_to_vmem [thread:$0]  %s1590_s3, 4096, %s45_s19, [#allocation6], %s1334_s0, %s1334_s0, %s1335_s21  }
  0x34   :  { %1323 = dma.done.wait [#allocation3], 1024  }
  0x35   :  { %1324 = vsyncadd [#allocation3], 4294966272 }
  0x36   :  { %1325 = dma.done.wait [#allocation6], 5120  }
  0x37   :  { %1326 = vsyncadd [#allocation6], 4294962176  ;;  %v1171_v0 = vld [vmem:[#allocation5] sm:$0xff]   ;;  %v1172_v1 = vld [vmem:[#allocation5 + $0x8] sm:$0xff]   ;;  %v1336_v48 = vmov 0  }
  0x38   :  { %1114 = vmatprep.subr.bf16.mxu0 %v1171_v0  ;;  %v1173_v2 = vld [vmem:[#allocation5 + $0x10] sm:$0xff]   ;;  %v1174_v3 = vld [vmem:[#allocation5 + $0x18] sm:$0xff]   ;;  %v1179_v4 = vld [vmem:[#allocation2] sm:$0xff]   ;;  %549 = vmatprep.mubr.bf16.mxu1 %v1336_v48 }
  0x39   :  { %1115 = vmatpush3.bf16.msra.mxu0 %v1171_v0  ;;  %1130 = vmatprep.mubr.bf16.mxu0 %v1179_v4  ;;  %v1175_v5 = vld [vmem:[#allocation5 + $0x20] sm:$0xff]   ;;  %v1176_v6 = vld [vmem:[#allocation5 + $0x28] sm:$0xff]   ;;  %v1177_v11 = vld [vmem:[#allocation5 + $0x30] sm:$0xff]  }
  0x3a   :  { %1116 = vmatprep.subr.bf16.mxu0 %v1172_v1  ;;  %v1187_v7 = vld [vmem:[#allocation7 + $0x4] ss:$16 sps:$4 sm:$0xff]   ;;  %v1189_v8 = vld [vmem:[#allocation7] ss:$16 sps:$4 sm:$0xff]   ;;  %v1178_v13 = vld [vmem:[#allocation5 + $0x38] sm:$0xff]  }
  0x3b   :  { %517 = vmatprep.subr.bf16.mxu1 %v1187_v7  ;;  %v1193_v9 = vld [vmem:[#allocation7 + $0x24] ss:$16 sps:$4 sm:$0xff]   ;;  %v1195_v10 = vld [vmem:[#allocation7 + $0x20] ss:$16 sps:$4 sm:$0xff]   ;;  %v1414_v16 = vld [vmem:[#allocation7 + $0xc] ss:$16 sps:$4 sm:$0xff]  }
  0x3c   :  { %518 = vmatpush1.bf16.msra.mxu1 %v1189_v8  ;;  %v1199_v12 = vld [vmem:[#allocation7 + $0x44] ss:$16 sps:$4 sm:$0xff]   ;;  %v1201_v14 = vld [vmem:[#allocation7 + $0x40] ss:$16 sps:$4 sm:$0xff]   ;;  %v1180_v19 = vld [vmem:[#allocation2 + $0x8] sm:$0xff]  }
  0x3d   :  { %1117 = vmatpush3.bf16.msra.mxu0 %v1172_v1  ;;  %519 = vmatprep.subr.bf16.mxu1 %v1193_v9  ;;  %v1205_v15 = vld [vmem:[#allocation7 + $0x64] ss:$16 sps:$4 sm:$0xff]   ;;  %v1207_v17 = vld [vmem:[#allocation7 + $0x60] ss:$16 sps:$4 sm:$0xff]   ;;  %v1416_v21 = vld [vmem:[#allocation7 + $0x8] ss:$16 sps:$4 sm:$0xff]  }
  0x3e   :  { %1118 = vmatprep.subr.bf16.mxu0 %v1173_v2  ;;  %v1211_v18 = vld [vmem:[#allocation7 + $0x84] ss:$16 sps:$4 sm:$0xff]   ;;  %v1418_v22 = vld [vmem:[#allocation7 + $0x2c] ss:$16 sps:$4 sm:$0xff]   ;;  %v1213_v23 = vld [vmem:[#allocation7 + $0x80] ss:$16 sps:$4 sm:$0xff]  }
  0x3f   :  { %v1181_v20 = vld [vmem:[#allocation2 + $0x10] sm:$0xff]   ;;  %v1422_v25 = vld [vmem:[#allocation7 + $0x28] ss:$16 sps:$4 sm:$0xff]   ;;  %v1425_v26 = vld [vmem:[#allocation7 + $0x4c] ss:$16 sps:$4 sm:$0xff]  }
  0x40   :  { %520 = vmatpush1.bf16.msra.mxu1 %v1195_v10  ;;  %v1217_v24 = vld [vmem:[#allocation7 + $0xa4] ss:$16 sps:$4 sm:$0xff]   ;;  %v1219_v27 = vld [vmem:[#allocation7 + $0xa0] ss:$16 sps:$4 sm:$0xff]   ;;  %v1182_v29 = vld [vmem:[#allocation2 + $0x18] sm:$0xff]  }
  0x41   :  { %1119 = vmatpush3.bf16.msra.mxu0 %v1173_v2  ;;  %521 = vmatprep.subr.bf16.mxu1 %v1199_v12  ;;  %v1223_v28 = vld [vmem:[#allocation7 + $0xc4] ss:$16 sps:$4 sm:$0xff]   ;;  %v1428_v31 = vld [vmem:[#allocation7 + $0x48] ss:$16 sps:$4 sm:$0xff]   ;;  %v1431_v32 = vld [vmem:[#allocation7 + $0x6c] ss:$16 sps:$4 sm:$0xff]  }
  0x42   :  { %1120 = vmatprep.subr.bf16.mxu0 %v1174_v3  ;;  %v1183_v30 = vld [vmem:[#allocation2 + $0x20] sm:$0xff]   ;;  %v1434_v33 = vld [vmem:[#allocation7 + $0x68] ss:$16 sps:$4 sm:$0xff]   ;;  %v1437_v34 = vld [vmem:[#allocation7 + $0x8c] ss:$16 sps:$4 sm:$0xff]  }
  0x43   :  { %v1184_v35 = vld [vmem:[#allocation2 + $0x28] sm:$0xff]   ;;  %v1185_v36 = vld [vmem:[#allocation2 + $0x30] sm:$0xff]   ;;  %v1186_v40 = vld [vmem:[#allocation2 + $0x38] sm:$0xff]  }
  0x44   :  { %522 = vmatpush1.bf16.msra.mxu1 %v1201_v14  ;;  %v1440_v37 = vld [vmem:[#allocation7 + $0x88] ss:$16 sps:$4 sm:$0xff]   ;;  %v1443_v38 = vld [vmem:[#allocation7 + $0xac] ss:$16 sps:$4 sm:$0xff]   ;;  %v1225_v42 = vld [vmem:[#allocation7 + $0xc0] ss:$16 sps:$4 sm:$0xff]  }
  0x45   :  { %1121 = vmatpush3.bf16.msra.mxu0 %v1174_v3  ;;  %523 = vmatprep.subr.bf16.mxu1 %v1205_v15  ;;  %v1446_v39 = vld [vmem:[#allocation7 + $0xa8] ss:$16 sps:$4 sm:$0xff]   ;;  %v1450_v41 = vld [vmem:[#allocation7 + $0xcc] ss:$16 sps:$4 sm:$0xff]   ;;  %v1229_v44 = vld [vmem:[#allocation7 + $0xe4] ss:$16 sps:$4 sm:$0xff]  }
  0x46   :  { %1122 = vmatprep.subr.bf16.mxu0 %v1175_v5  ;;  %v1452_v43 = vld [vmem:[#allocation7 + $0xc8] ss:$16 sps:$4 sm:$0xff]   ;;  %v1456_v45 = vld [vmem:[#allocation7 + $0xec] ss:$16 sps:$4 sm:$0xff]   ;;  %v1231_v46 = vld [vmem:[#allocation7 + $0xe0] ss:$16 sps:$4 sm:$0xff]  }
  0x47   :  { %v1458_v47 = vld [vmem:[#allocation7 + $0xe8] ss:$16 sps:$4 sm:$0xff]   ;;  %v985_v50 = vld [vmem:[%s1589_s2] ss:$0 sm:$0xff] }
  0x48   :  { %524 = vmatpush1.bf16.msra.mxu1 %v1207_v17 }
  0x49   :  { %1123 = vmatpush3.bf16.msra.mxu0 %v1175_v5  ;;  %525 = vmatprep.subr.bf16.mxu1 %v1211_v18 }
  0x4a   :  { %1124 = vmatprep.subr.bf16.mxu0 %v1176_v6 }
  0x4c   :  { %526 = vmatpush1.bf16.msra.mxu1 %v1213_v23 }
  0x4d   :  { %1125 = vmatpush3.bf16.msra.mxu0 %v1176_v6  ;;  %527 = vmatprep.subr.bf16.mxu1 %v1217_v24 }
  0x4e   :  { %1126 = vmatprep.subr.bf16.mxu0 %v1177_v11 }
  0x50   :  { %528 = vmatpush1.bf16.msra.mxu1 %v1219_v27 }
  0x51   :  { %1127 = vmatpush3.bf16.msra.mxu0 %v1177_v11  ;;  %529 = vmatprep.subr.bf16.mxu1 %v1223_v28 }
  0x52   :  { %1128 = vmatprep.subr.bf16.mxu0 %v1178_v13 }
  0x54   :  { %530 = vmatpush1.bf16.msra.mxu1 %v1225_v42 }
  0x55   :  { %1129 = vmatpush3.bf16.msra.mxu0 %v1178_v13  ;;  %531 = vmatprep.subr.bf16.mxu1 %v1229_v44 }
  0x56   :  { %630 = vmatprep.subr.bf16.mxu0 %v1414_v16 }
  0x58   :  { %1131 = vmatmul.mubr.bf16.vlgmr.msra.gmra.mrb[0].mxu0 %v1180_v19  ;;  %532 = vmatpush1.bf16.msra.mxu1 %v1231_v46 }
  0x59   :  { %1134 = vmatprep.mubr.bf16.mxu0 %v1181_v20  ;;  %631 = vmatpush1.bf16.msra.mxu0 %v1416_v21 }
  0x5a   :  { %632 = vmatprep.subr.bf16.mxu0 %v1418_v22  ;;  %1146 = vmatprep.subr.bf16.mxu1 %v1414_v16 }
  0x5d   :  { %633 = vmatpush1.bf16.msra.mxu0 %v1422_v25 }
  0x5e   :  { %634 = vmatprep.subr.bf16.mxu0 %v1425_v26 }
  0x60   :  { %1135 = vmatmul.mubr.bf16.gmra.mrb[4].mxu0 %v1182_v29 }
  0x61   :  { %1138 = vmatprep.mubr.bf16.mxu0 %v1183_v30  ;;  %635 = vmatpush1.bf16.msra.mxu0 %v1428_v31  ;;  %v335_v30 = vld [vmem:[%s1591_s4] sm:$0xf]  ;;  %s1337_s4 = smov [#allocation8]  }
  0x62   :  { %636 = vmatprep.subr.bf16.mxu0 %v1431_v32  ;;  %s972_s8 = sshll.u32 %s1337_s4, 4  ;;  %s973_s8 = int_to_ptr.vmem [resolvable:$true] %s972_s8 }
  0x63   :  { %s1301_s9 = scalar_lea.vmem %s973_s8, 4096  ;;  %p1306_p11 = scmp.lt.s32.totalorder %s973_s8, %s973_s8 }
  0x64   :  { %p1302_p10 = scmp.ne.s32.totalorder %s973_s8, %s1301_s9  ;;  %p1307_p12 = scmp.lt.s32.totalorder %s1301_s9, %s1301_s9 }
  0x65   :  { %637 = vmatpush1.bf16.msra.mxu0 %v1434_v33 }
  0x66   :  { %638 = vmatprep.subr.bf16.mxu0 %v1437_v34  ;;  %p1308_p13 = por %p1307_p12, %p1306_p11 }
  0x68   :  { %1139 = vmatmul.mubr.bf16.gmra.mrb[8].mxu0 %v1184_v35  ;;  %p1309_p0 = pnand %p1308_p13, %p1302_p10 }
  0x69   :  { %1142 = vmatprep.mubr.bf16.mxu0 %v1185_v36  ;;  %639 = vmatpush1.bf16.msra.mxu0 %v1440_v37 }
  0x6a   :  { %640 = vmatprep.subr.bf16.mxu0 %v1443_v38 }
  0x6d   :  { %641 = vmatpush1.bf16.msra.mxu0 %v1446_v39 }
  0x6e   :  { %642 = vmatprep.subr.bf16.mxu0 %v1450_v41 }
  0x70   :  { %1143 = vmatmul.mubr.bf16.gmra.mrb[12].mxu0 %v1186_v40 }
  0x71   :  { %643 = vmatpush1.bf16.msra.mxu0 %v1452_v43  ;;  %662 = vmatprep.mubr.bf16.mxu0 %v1336_v48 }
  0x72   :  { %644 = vmatprep.subr.bf16.mxu0 %v1456_v45 }
  0x75   :  { %645 = vmatpush1.bf16.msra.mxu0 %v1458_v47 }
 0x12b   :  { %v1132_v49 = vpop.f32.mrb[0].mxu0 }
 0x12c   :  { %v232_v51 = vpop.f32.mrb[1].mxu0  ;;  %v241_v53 = vadd.f32 %v1132_v49, %v985_v50 }
 0x12d   :  { %v1133_v52 = vpop.f32.mrb[2].mxu0  ;;  %v233_v56 = vadd.f32 %v985_v50, %v232_v51 }
 0x12e   :  { %v244_v54 = vadd.f32 %v1133_v52, %v985_v50  ;;  %v235_v55 = vpop.f32.mrb[3].mxu0 }
 0x12f   :  { %v236_v57 = vadd.f32 %v985_v50, %v235_v55 }
 0x130   :  { %v296_v58 = vpack.c.bf16 %v244_v54, %v241_v53 }
 0x131   :  { %v295_v59 = vpack.c.bf16 %v236_v57, %v233_v56 }
 0x133   :  { %550 = vmatmul.mubr.bf16.vlgmr.msra.gmra.mrb[0].mxu1 %v295_v59  ;;  %663 = vmatmul.mubr.bf16.vlgmr.msra.gmra.mrb[16].mxu0 %v295_v59  ;;  %v1136_v60 = vpop.f32.mrb[4].mxu0 }
 0x134   :  { %1154 = vmatpush1.bf16.msra.mxu1 %v1416_v21  ;;  %v257_v61 = vadd.f32 %v1136_v60, %v985_v50  ;;  %v248_v62 = vpop.f32.mrb[5].mxu0  ;;  %559 = vmatprep.mubr.bf16.mxu1 %v1336_v48 }
 0x135   :  { %v249_v63 = vadd.f32 %v985_v50, %v248_v62  ;;  %v1137_v0 = vpop.f32.mrb[6].mxu0  ;;  %1147 = vmatprep.subr.bf16.mxu1 %v1418_v22  ;;  %672 = vmatprep.mubr.bf16.mxu0 %v1336_v48 }
 0x136   :  { %v260_v1 = vadd.f32 %v1137_v0, %v985_v50  ;;  %v251_v2 = vpop.f32.mrb[7].mxu0 }
 0x137   :  { %v252_v3 = vadd.f32 %v985_v50, %v251_v2 }
 0x138   :  { %v298_v4 = vpack.c.bf16 %v260_v1, %v257_v61  ;;  %1155 = vmatpush1.bf16.msra.mxu1 %v1422_v25 }
 0x139   :  { %v297_v5 = vpack.c.bf16 %v252_v3, %v249_v63  ;;  %1148 = vmatprep.subr.bf16.mxu1 %v1425_v26  ;;  %v337_v26 = vlaneseq }
 0x13b   :  { %560 = vmatmul.mubr.bf16.gmra.mrb[4].mxu1 %v296_v58  ;;  %673 = vmatmul.mubr.bf16.gmra.mrb[20].mxu0 %v296_v58  ;;  %v1140_v6 = vpop.f32.mrb[8].mxu0  ;;  %v338_v27 = vshrl.u32 %v337_v26, 7 }
 0x13c   :  { %569 = vmatprep.mubr.bf16.mxu1 %v1336_v48  ;;  %682 = vmatprep.mubr.bf16.mxu0 %v1336_v48  ;;  %v273_v7 = vadd.f32 %v1140_v6, %v985_v50  ;;  %v264_v8 = vpop.f32.mrb[9].mxu0 }
 0x13d   :  { %1156 = vmatpush1.bf16.msra.mxu1 %v1428_v31  ;;  %v265_v9 = vadd.f32 %v985_v50, %v264_v8  ;;  %v1141_v10 = vpop.f32.mrb[10].mxu0  ;;  %v339_v28 = vsub.s32 0, %v338_v27  ;;  %v347_v29 = vsub.s32 2, %v338_v27  ;;  %v343_v31 = vsub.s32 1, %v338_v27 }
 0x13e   :  { %v276_v11 = vadd.f32 %v1141_v10, %v985_v50  ;;  %1149 = vmatprep.subr.bf16.mxu1 %v1431_v32  ;;  %v267_v12 = vpop.f32.mrb[11].mxu0  ;;  %v351_v32 = vsub.s32 3, %v338_v27 }
 0x13f   :  { %v268_v13 = vadd.f32 %v985_v50, %v267_v12  ;;  %v1504_v35 = vrot.slane %v335_v30, %v343_v31 }
 0x140   :  { %v300_v14 = vpack.c.bf16 %v276_v11, %v273_v7  ;;  %v1506_v36 = vrot.slane %v335_v30, %v351_v32 }
 0x141   :  { %v299_v15 = vpack.c.bf16 %v268_v13, %v265_v9  ;;  %1157 = vmatpush1.bf16.msra.mxu1 %v1434_v33  ;;  %v1500_v33 = vrot.slane %v335_v30, %v339_v28 }
 0x142   :  { %1150 = vmatprep.subr.bf16.mxu1 %v1437_v34  ;;  %v1502_v34 = vrot.slane %v335_v30, %v347_v29 }
 0x143   :  { %570 = vmatmul.mubr.bf16.gmra.mrb[8].mxu1 %v297_v5  ;;  %683 = vmatmul.mubr.bf16.gmra.mrb[24].mxu0 %v297_v5  ;;  %v1144_v16 = vpop.f32.mrb[12].mxu0 }
 0x144   :  { %579 = vmatprep.mubr.bf16.mxu1 %v1336_v48  ;;  %692 = vmatprep.mubr.bf16.mxu0 %v1336_v48  ;;  %v289_v17 = vadd.f32 %v1144_v16, %v985_v50  ;;  %v280_v18 = vpop.f32.mrb[13].mxu0 }
 0x145   :  { %1158 = vmatpush1.bf16.msra.mxu1 %v1440_v37  ;;  %v281_v19 = vadd.f32 %v985_v50, %v280_v18  ;;  %v1145_v20 = vpop.f32.mrb[14].mxu0 }
 0x146   :  { %v292_v21 = vadd.f32 %v1145_v20, %v985_v50  ;;  %1151 = vmatprep.subr.bf16.mxu1 %v1443_v38  ;;  %v283_v22 = vpop.f32.mrb[15].mxu0 }
 0x147   :  { %v284_v23 = vadd.f32 %v985_v50, %v283_v22 }
 0x148   :  { %v302_v24 = vpack.c.bf16 %v292_v21, %v289_v17 }
 0x149   :  { %v301_v25 = vpack.c.bf16 %v284_v23, %v281_v19  ;;  %1159 = vmatpush1.bf16.msra.mxu1 %v1446_v39 }
 0x14a   :  { %1152 = vmatprep.subr.bf16.mxu1 %v1450_v41 }
 0x14b   :  { %580 = vmatmul.mubr.bf16.gmra.mrb[12].mxu1 %v298_v4  ;;  %693 = vmatmul.mubr.bf16.gmra.mrb[28].mxu0 %v298_v4 }
 0x14c   :  { %589 = vmatprep.mubr.bf16.mxu1 %v1336_v48  ;;  %702 = vmatprep.mubr.bf16.mxu0 %v1336_v48 }
 0x14d   :  { %1160 = vmatpush1.bf16.msra.mxu1 %v1452_v43 }
 0x14e   :  { %1153 = vmatprep.subr.bf16.mxu1 %v1456_v45 }
 0x151   :  { %1161 = vmatpush1.bf16.msra.mxu1 %v1458_v47 }
 0x153   :  { %590 = vmatmul.mubr.bf16.gmra.mrb[16].mxu1 %v299_v15  ;;  %703 = vmatmul.mubr.bf16.gmra.mrb[32].mxu0 %v299_v15 }
 0x154   :  { %599 = vmatprep.mubr.bf16.mxu1 %v1336_v48  ;;  %712 = vmatprep.mubr.bf16.mxu0 %v1336_v48 }
 0x15b   :  { %600 = vmatmul.mubr.bf16.gmra.mrb[20].mxu1 %v300_v14  ;;  %713 = vmatmul.mubr.bf16.gmra.mrb[36].mxu0 %v300_v14 }
 0x15c   :  { %609 = vmatprep.mubr.bf16.mxu1 %v1336_v48 }
 0x163   :  { %610 = vmatmul.mubr.bf16.gmra.mrb[24].mxu1 %v301_v25 }
 0x164   :  { %619 = vmatprep.mubr.bf16.mxu1 %v1336_v48 }
 0x16b   :  { %620 = vmatmul.mubr.bf16.gmra.mrb[28].mxu1 %v302_v24 }
 0x16c   :  { %722 = vmatprep.mubr.bf16.mxu1 %v1336_v48 }
 0x173   :  { %723 = vmatmul.mubr.bf16.vlgmr.msra.gmra.mrb[32].mxu1 %v301_v25 }
 0x174   :  { %732 = vmatprep.mubr.bf16.mxu1 %v1336_v48 }
 0x17b   :  { %733 = vmatmul.mubr.bf16.gmra.mrb[36].mxu1 %v302_v24 }
 0x206   :  { %v551_v37 = vpop.f32.mrb[0].mxu1  ;;  %v664_v38 = vpop.f32.mrb[16].mxu0 }
 0x207   :  { %v552_v39 = vadd.f32 %v551_v37, %v1500_v33  ;;  %v665_v40 = vadd.f32 %v664_v38, %v1502_v34  ;;  %v553_v41 = vpop.f32.mrb[1].mxu1  ;;  %v666_v42 = vpop.f32.mrb[17].mxu0 }
 0x208   :  { %v554_v43 = vadd.f32 %v553_v41, %v1504_v35  ;;  %v667_v44 = vadd.f32 %v666_v42, %v1506_v36  ;;  %v555_v45 = vpop.f32.mrb[2].mxu1  ;;  %v668_v46 = vpop.f32.mrb[18].mxu0 }
 0x209   :  { %v556_v47 = vadd.f32 %v555_v45, %v1500_v33  ;;  %v669_v48 = vadd.f32 %v668_v46, %v1502_v34  ;;  %v557_v49 = vpop.f32.mrb[3].mxu1  ;;  %v670_v50 = vpop.f32.mrb[19].mxu0 }
 0x20a   :  { %v1066_v51 = vpack.c.bf16 %v554_v43, %v552_v39  ;;  %v1067_v52 = vpack.c.bf16 %v667_v44, %v665_v40  ;;  %v558_v53 = vadd.f32 %v557_v49, %v1504_v35  ;;  %v671_v54 = vadd.f32 %v670_v50, %v1506_v36 }
 0x20c   :  { %935 = vst [vmem:[#allocation8] sm:$0xff] %v1066_v51  ;;  %936 = vst [vmem:[#allocation8 + $0x8] sm:$0xff] %v1067_v52  ;;  %v1068_v55 = vpack.c.bf16 %v558_v53, %v556_v47  ;;  %v1069_v56 = vpack.c.bf16 %v671_v54, %v669_v48 }
 0x20e   :  { %937 = vst [vmem:[#allocation8 + $0x10] sm:$0xff] %v1068_v55  ;;  %938 = vst [vmem:[#allocation8 + $0x18] sm:$0xff] %v1069_v56  ;;  %v561_v57 = vpop.f32.mrb[4].mxu1  ;;  %v674_v58 = vpop.f32.mrb[20].mxu0 }
 0x20f   :  { %v562_v59 = vadd.f32 %v561_v57, %v1500_v33  ;;  %v675_v60 = vadd.f32 %v674_v58, %v1502_v34  ;;  %v563_v61 = vpop.f32.mrb[5].mxu1  ;;  %v676_v62 = vpop.f32.mrb[21].mxu0 }
 0x210   :  { %v564_v63 = vadd.f32 %v563_v61, %v1504_v35  ;;  %v677_v0 = vadd.f32 %v676_v62, %v1506_v36  ;;  %v565_v1 = vpop.f32.mrb[6].mxu1  ;;  %v678_v2 = vpop.f32.mrb[22].mxu0 }
 0x211   :  { %v566_v3 = vadd.f32 %v565_v1, %v1500_v33  ;;  %v679_v4 = vadd.f32 %v678_v2, %v1502_v34  ;;  %v567_v5 = vpop.f32.mrb[7].mxu1  ;;  %v680_v6 = vpop.f32.mrb[23].mxu0 }
 0x212   :  { %v1070_v7 = vpack.c.bf16 %v564_v63, %v562_v59  ;;  %v1071_v8 = vpack.c.bf16 %v677_v0, %v675_v60  ;;  %v568_v9 = vadd.f32 %v567_v5, %v1504_v35  ;;  %v681_v10 = vadd.f32 %v680_v6, %v1506_v36 }
 0x214   :  { %939 = vst [vmem:[#allocation8 + $0x20] sm:$0xff] %v1070_v7  ;;  %940 = vst [vmem:[#allocation8 + $0x28] sm:$0xff] %v1071_v8  ;;  %v1072_v11 = vpack.c.bf16 %v568_v9, %v566_v3  ;;  %v1073_v12 = vpack.c.bf16 %v681_v10, %v679_v4 }
 0x216   :  { %941 = vst [vmem:[#allocation8 + $0x30] sm:$0xff] %v1072_v11  ;;  %942 = vst [vmem:[#allocation8 + $0x38] sm:$0xff] %v1073_v12  ;;  %v571_v13 = vpop.f32.mrb[8].mxu1  ;;  %v684_v14 = vpop.f32.mrb[24].mxu0 }
 0x217   :  { %v572_v15 = vadd.f32 %v571_v13, %v1500_v33  ;;  %v685_v16 = vadd.f32 %v684_v14, %v1502_v34  ;;  %v573_v17 = vpop.f32.mrb[9].mxu1  ;;  %v686_v18 = vpop.f32.mrb[25].mxu0 }
 0x218   :  { %v574_v19 = vadd.f32 %v573_v17, %v1504_v35  ;;  %v687_v20 = vadd.f32 %v686_v18, %v1506_v36  ;;  %v575_v21 = vpop.f32.mrb[10].mxu1  ;;  %v688_v22 = vpop.f32.mrb[26].mxu0 }
 0x219   :  { %v576_v23 = vadd.f32 %v575_v21, %v1500_v33  ;;  %v689_v24 = vadd.f32 %v688_v22, %v1502_v34  ;;  %v577_v25 = vpop.f32.mrb[11].mxu1  ;;  %v690_v26 = vpop.f32.mrb[27].mxu0 }
 0x21a   :  { %v1074_v27 = vpack.c.bf16 %v574_v19, %v572_v15  ;;  %v1075_v28 = vpack.c.bf16 %v687_v20, %v685_v16  ;;  %v578_v29 = vadd.f32 %v577_v25, %v1504_v35  ;;  %v691_v30 = vadd.f32 %v690_v26, %v1506_v36 }
 0x21c   :  { %943 = vst [vmem:[#allocation8 + $0x40] sm:$0xff] %v1074_v27  ;;  %944 = vst [vmem:[#allocation8 + $0x48] sm:$0xff] %v1075_v28  ;;  %v1076_v31 = vpack.c.bf16 %v578_v29, %v576_v23  ;;  %v1077_v32 = vpack.c.bf16 %v691_v30, %v689_v24 }
 0x21e   :  { %945 = vst [vmem:[#allocation8 + $0x50] sm:$0xff] %v1076_v31  ;;  %946 = vst [vmem:[#allocation8 + $0x58] sm:$0xff] %v1077_v32  ;;  %v581_v37 = vpop.f32.mrb[12].mxu1  ;;  %v694_v38 = vpop.f32.mrb[28].mxu0 }
 0x21f   :  { %v582_v39 = vadd.f32 %v581_v37, %v1500_v33  ;;  %v695_v40 = vadd.f32 %v694_v38, %v1502_v34  ;;  %v583_v41 = vpop.f32.mrb[13].mxu1  ;;  %v696_v42 = vpop.f32.mrb[29].mxu0 }
 0x220   :  { %v584_v43 = vadd.f32 %v583_v41, %v1504_v35  ;;  %v697_v44 = vadd.f32 %v696_v42, %v1506_v36  ;;  %v585_v45 = vpop.f32.mrb[14].mxu1  ;;  %v698_v46 = vpop.f32.mrb[30].mxu0 }
 0x221   :  { %v586_v47 = vadd.f32 %v585_v45, %v1500_v33  ;;  %v699_v48 = vadd.f32 %v698_v46, %v1502_v34  ;;  %v587_v49 = vpop.f32.mrb[15].mxu1  ;;  %v700_v50 = vpop.f32.mrb[31].mxu0 }
 0x222   :  { %v1078_v51 = vpack.c.bf16 %v584_v43, %v582_v39  ;;  %v1079_v52 = vpack.c.bf16 %v697_v44, %v695_v40  ;;  %v588_v53 = vadd.f32 %v587_v49, %v1504_v35  ;;  %v701_v54 = vadd.f32 %v700_v50, %v1506_v36 }
 0x224   :  { %947 = vst [vmem:[#allocation8 + $0x60] sm:$0xff] %v1078_v51  ;;  %948 = vst [vmem:[#allocation8 + $0x68] sm:$0xff] %v1079_v52  ;;  %v1080_v55 = vpack.c.bf16 %v588_v53, %v586_v47  ;;  %v1081_v56 = vpack.c.bf16 %v701_v54, %v699_v48 }
 0x226   :  { %949 = vst [vmem:[#allocation8 + $0x70] sm:$0xff] %v1080_v55  ;;  %950 = vst [vmem:[#allocation8 + $0x78] sm:$0xff] %v1081_v56  ;;  %v591_v57 = vpop.f32.mrb[16].mxu1  ;;  %v704_v58 = vpop.f32.mrb[32].mxu0 }
 0x227   :  { %v592_v59 = vadd.f32 %v591_v57, %v1500_v33  ;;  %v705_v60 = vadd.f32 %v704_v58, %v1502_v34  ;;  %v593_v61 = vpop.f32.mrb[17].mxu1  ;;  %v706_v62 = vpop.f32.mrb[33].mxu0 }
 0x228   :  { %v594_v63 = vadd.f32 %v593_v61, %v1504_v35  ;;  %v707_v0 = vadd.f32 %v706_v62, %v1506_v36  ;;  %v595_v1 = vpop.f32.mrb[18].mxu1  ;;  %v708_v2 = vpop.f32.mrb[34].mxu0 }
 0x229   :  { %v596_v3 = vadd.f32 %v595_v1, %v1500_v33  ;;  %v709_v4 = vadd.f32 %v708_v2, %v1502_v34  ;;  %v597_v5 = vpop.f32.mrb[19].mxu1  ;;  %v710_v6 = vpop.f32.mrb[35].mxu0 }
 0x22a   :  { %v1082_v7 = vpack.c.bf16 %v594_v63, %v592_v59  ;;  %v1083_v8 = vpack.c.bf16 %v707_v0, %v705_v60  ;;  %v598_v9 = vadd.f32 %v597_v5, %v1504_v35  ;;  %v711_v10 = vadd.f32 %v710_v6, %v1506_v36 }
 0x22c   :  { %951 = vst [vmem:[#allocation8 + $0x80] sm:$0xff] %v1082_v7  ;;  %952 = vst [vmem:[#allocation8 + $0x88] sm:$0xff] %v1083_v8  ;;  %v1084_v11 = vpack.c.bf16 %v598_v9, %v596_v3  ;;  %v1085_v12 = vpack.c.bf16 %v711_v10, %v709_v4 }
 0x22e   :  { %953 = vst [vmem:[#allocation8 + $0x90] sm:$0xff] %v1084_v11  ;;  %954 = vst [vmem:[#allocation8 + $0x98] sm:$0xff] %v1085_v12  ;;  %v601_v13 = vpop.f32.mrb[20].mxu1  ;;  %v714_v14 = vpop.f32.mrb[36].mxu0 }
 0x22f   :  { %v602_v15 = vadd.f32 %v601_v13, %v1500_v33  ;;  %v715_v16 = vadd.f32 %v714_v14, %v1502_v34  ;;  %v603_v17 = vpop.f32.mrb[21].mxu1  ;;  %v716_v18 = vpop.f32.mrb[37].mxu0 }
 0x230   :  { %v604_v19 = vadd.f32 %v603_v17, %v1504_v35  ;;  %v717_v20 = vadd.f32 %v716_v18, %v1506_v36  ;;  %v605_v21 = vpop.f32.mrb[22].mxu1  ;;  %v718_v22 = vpop.f32.mrb[38].mxu0 }
 0x231   :  { %v606_v23 = vadd.f32 %v605_v21, %v1500_v33  ;;  %v719_v24 = vadd.f32 %v718_v22, %v1502_v34  ;;  %v607_v25 = vpop.f32.mrb[23].mxu1  ;;  %v720_v26 = vpop.f32.mrb[39].mxu0 }
 0x232   :  { %v1086_v27 = vpack.c.bf16 %v604_v19, %v602_v15  ;;  %v1087_v28 = vpack.c.bf16 %v717_v20, %v715_v16  ;;  %v608_v29 = vadd.f32 %v607_v25, %v1504_v35  ;;  %v721_v30 = vadd.f32 %v720_v26, %v1506_v36 }
 0x234   :  { %955 = vst [vmem:[#allocation8 + $0xa0] sm:$0xff] %v1086_v27  ;;  %956 = vst [vmem:[#allocation8 + $0xa8] sm:$0xff] %v1087_v28  ;;  %v1088_v31 = vpack.c.bf16 %v608_v29, %v606_v23  ;;  %v1089_v32 = vpack.c.bf16 %v721_v30, %v719_v24 }
 0x236   :  { %957 = vst [vmem:[#allocation8 + $0xb0] sm:$0xff] %v1088_v31  ;;  %958 = vst [vmem:[#allocation8 + $0xb8] sm:$0xff] %v1089_v32  ;;  %v611_v37 = vpop.f32.mrb[24].mxu1 }
 0x237   :  { %v612_v38 = vadd.f32 %v611_v37, %v1500_v33  ;;  %v613_v39 = vpop.f32.mrb[25].mxu1 }
 0x238   :  { %v614_v40 = vadd.f32 %v613_v39, %v1504_v35  ;;  %v615_v41 = vpop.f32.mrb[26].mxu1 }
 0x239   :  { %v616_v42 = vadd.f32 %v615_v41, %v1500_v33  ;;  %v617_v43 = vpop.f32.mrb[27].mxu1 }
 0x23a   :  { %v1090_v44 = vpack.c.bf16 %v614_v40, %v612_v38  ;;  %v618_v45 = vadd.f32 %v617_v43, %v1504_v35 }
 0x23c   :  { %959 = vst [vmem:[#allocation8 + $0xc0] sm:$0xff] %v1090_v44  ;;  %v1092_v46 = vpack.c.bf16 %v618_v45, %v616_v42 }
 0x23e   :  { %961 = vst [vmem:[#allocation8 + $0xd0] sm:$0xff] %v1092_v46  ;;  %v621_v47 = vpop.f32.mrb[28].mxu1 }
 0x23f   :  { %v622_v48 = vadd.f32 %v621_v47, %v1500_v33  ;;  %v623_v49 = vpop.f32.mrb[29].mxu1 }
 0x240   :  { %v624_v50 = vadd.f32 %v623_v49, %v1504_v35  ;;  %v625_v51 = vpop.f32.mrb[30].mxu1 }
 0x241   :  { %v626_v52 = vadd.f32 %v625_v51, %v1500_v33  ;;  %v627_v53 = vpop.f32.mrb[31].mxu1 }
 0x242   :  { %v1094_v54 = vpack.c.bf16 %v624_v50, %v622_v48  ;;  %v628_v55 = vadd.f32 %v627_v53, %v1504_v35 }
 0x244   :  { %963 = vst [vmem:[#allocation8 + $0xe0] sm:$0xff] %v1094_v54  ;;  %v1096_v56 = vpack.c.bf16 %v628_v55, %v626_v52 }
 0x246   :  { %965 = vst [vmem:[#allocation8 + $0xf0] sm:$0xff] %v1096_v56  ;;  %v724_v57 = vpop.f32.mrb[32].mxu1 }
 0x247   :  { %v725_v58 = vadd.f32 %v724_v57, %v1502_v34  ;;  %v726_v59 = vpop.f32.mrb[33].mxu1 }
 0x248   :  { %v727_v60 = vadd.f32 %v726_v59, %v1506_v36  ;;  %v728_v61 = vpop.f32.mrb[34].mxu1 }
 0x249   :  { %v729_v62 = vadd.f32 %v728_v61, %v1502_v34  ;;  %v730_v63 = vpop.f32.mrb[35].mxu1 }
 0x24a   :  { %v1091_v0 = vpack.c.bf16 %v727_v60, %v725_v58  ;;  %v731_v33 = vadd.f32 %v730_v63, %v1506_v36 }
 0x24c   :  { %960 = vst [vmem:[#allocation8 + $0xc8] sm:$0xff] %v1091_v0  ;;  %v1093_v1 = vpack.c.bf16 %v731_v33, %v729_v62 }
 0x24e   :  { %962 = vst [vmem:[#allocation8 + $0xd8] sm:$0xff] %v1093_v1  ;;  %v734_v35 = vpop.f32.mrb[36].mxu1 }
 0x24f   :  { %v735_v2 = vadd.f32 %v734_v35, %v1502_v34  ;;  %v736_v3 = vpop.f32.mrb[37].mxu1 }
 0x250   :  { %v737_v4 = vadd.f32 %v736_v3, %v1506_v36  ;;  %v738_v5 = vpop.f32.mrb[38].mxu1 }
 0x251   :  { %v739_v6 = vadd.f32 %v738_v5, %v1502_v34  ;;  %v740_v7 = vpop.f32.mrb[39].mxu1 }
 0x252   :  { %v1095_v8 = vpack.c.bf16 %v737_v4, %v735_v2  ;;  %v741_v9 = vadd.f32 %v740_v7, %v1506_v36 }
 0x254   :  { %964 = vst [vmem:[#allocation8 + $0xe8] sm:$0xff] %v1095_v8  ;;  %v1097_v10 = vpack.c.bf16 %v741_v9, %v739_v6 }
 0x256   :  { %966 = vst [vmem:[#allocation8 + $0xf8] sm:$0xff] %v1097_v10 }
 0x257   :  { %1312 = shalt.err (!%p1309_p0)
}
 0x258   :  { %s1313_s12 = scalar_lea.hbm %s1592_s5, 4096 }
 0x259   :  { %p1314_p1 = scmp.ne.s32.totalorder %s1592_s5, %s1313_s12  ;;  %p1317_p2 = scmp.lt.u32.totalorder %s1313_s12, %s1592_s5 }
 0x25b   :  { %p1319_p3 = pnand %p1317_p2, %p1314_p1 }
 0x25d   :  { %1322 = shalt.err (!%p1319_p3)
}
 0x25e   :  { %978 = dma.vmem_to_hbm [thread:$0]  %s973_s8, 4096, %s1592_s5, [#allocation4], %s1334_s0, %s1334_s0, %s1335_s21  }
 0x25f   :  { %1327 = dma.done.wait [#allocation4], 4096  }
 0x260   :  { %1328 = vsyncadd [#allocation4], 4294963200 }
 0x261   :  { %982 = vsyncpa [#allocation3], 1 }
 0x262   :  { %983 = vsyncpa [#allocation6], 1 }
 0x263   :  { %984 = vsyncpa [#allocation4], 1 }

</bundles_post_ra>
